<compile_context>
chip_gen: v5e
topology: v5e:2x2
jax: 0.10.0
libtpu: 0.0.40
codegen_flags: <defaults>
</compile_context>

<pallas_src>
import jax
import jax.numpy as jnp
from jax.experimental import pallas as pl
from jax.experimental.pallas import tpu as pltpu


def _copy_kernel(x_ref, o_ref):
    # Identity copy of the current (rows, F) block — the entire "compute" of
    # Unflatten is moving bytes through VMEM unchanged.
    o_ref[...] = x_ref[...]


def _choose_row_block(
    n_rows,
    bytes_per_row,
    itemsize,
    target_tile_bytes=4 << 20,   # ~4 MiB blocks: past the roofline knee, safe on v7x
    min_tile_bytes=1 << 20,      # don't shrink blocks below ~1 MiB chasing step count
    min_grid_steps=8,            # >= ~4 blocks per TensorCore on v7x for pipelining
):
    """Pick a batch-row block size for a lane-dense (rows, F) identity copy.

    Returns either the full batch (single block, only for small inputs), an
    exact divisor of N that is a multiple of the dtype's sublane packing, or a
    packed multiple (Pallas masks the remainder block automatically).
    """
    # Dtype-aware sublane packing: f32 -> 8 rows/vreg, bf16/fp16 -> 16, int8/fp8 -> 32.
    sub = {4: 8, 2: 16, 1: 32}.get(int(itemsize), 8)

    total_bytes = n_rows * bytes_per_row
    # Small tensors: one block; there is nothing worth pipelining.
    if total_bytes <= max(min_tile_bytes, sub * bytes_per_row):
        return n_rows

    # Cap the block so the grid has at least `min_grid_steps` blocks when the
    # tensor is large enough, but never below ~1 MiB per block.
    tgt = min(target_tile_bytes, max(min_tile_bytes, total_bytes // min_grid_steps))
    max_rows = max(sub, int(tgt // max(1, bytes_per_row)))
    if n_rows <= max_rows:
        return n_rows

    tn = max(sub, (max_rows // sub) * sub)

    # Prefer an exact divisor of N (no masked tail), but never accept a block
    # smaller than ~half the target: a masked tail block is far cheaper than
    # collapsing to tiny tiles (e.g. 8-row / ~200 KiB blocks for N = 8*prime).
    floor = max(sub, tn // 2)
    cand = tn
    while cand >= floor:
        if n_rows % cand == 0:
            return cand
        cand -= sub
    return tn  # fall back: cdiv grid + masked tail block


def unflatten(x, C=128, H=7, W=7, use_pallas=None):
    """Pallas equivalent of Unflatten.forward: x.view(-1, C, H, W).

    x: (N, C*H*W) array. Returns (N, C, H, W) with the same dtype.
    use_pallas: None -> heuristic (reshape fast path for small inputs),
                True/False -> force / skip the Pallas copy path.
    """
    N, F = x.shape
    assert F == C * H * W, f"flat dim {F} != C*H*W = {C * H * W}"

    itemsize = jnp.dtype(x.dtype).itemsize
    total_bytes = N * F * itemsize

    # Fast path: reshape is metadata-only and is the true optimum.  For small
    # inputs the pallas_call launch + DMA fixed cost would dominate by orders
    # of magnitude, so skip the copy entirely unless explicitly requested.
    if use_pallas is None:
        use_pallas = total_bytes >= (1 << 20)
    if not use_pallas:
        return x.reshape(N, C, H, W)

    tn = _choose_row_block(N, F * itemsize, itemsize)
    grid = (pl.cdiv(N, tn),)

    flat_out = pl.pallas_call(
        _copy_kernel,
        out_shape=jax.ShapeDtypeStruct((N, F), x.dtype),
        grid=grid,
        # Lane dim is the full feature axis F (full array dim => layout rule is
        # satisfied even when F is not a multiple of 128, and lane stores stay
        # unmasked); sublane dim is a packed multiple or the full batch.
        in_specs=[pl.BlockSpec((tn, F), lambda i: (i, 0))],
        out_specs=pl.BlockSpec((tn, F), lambda i: (i, 0)),
        # Reuse/donate the input HBM allocation for the output (per-block index
        # maps are identical, so aliased regions are written with their own
        # values).  Note: this only saves the output allocation; it does not
        # remove the read+write HBM traffic.
        input_output_aliases={0: 0},
        compiler_params=pltpu.CompilerParams(
            # Batch-block axis sharded across TensorCores (pays off on v7x's
            # two TCs; measured neutral on single-TC v5e/v6e).
            dimension_semantics=("parallel",),
            # <= 4 MiB tiles * (in + out) * double buffering = <= 16 MiB, well
            # inside the 32 MiB scoped budget on every generation incl. v7x.
            vmem_limit_bytes=32 * 1024 * 1024,
        ),
    )(x)

    # TODO(synk): a direct HBM->HBM DMA (memory_space=pl.ANY + make_async_copy)
    # would drop the VMEM staging entirely; the pipelined blocked copy above is
    # kept as the proven-lowering path and is already HBM-roofline-bound.

    # Metadata-only reshape (no data movement) to NCHW, matching torch .view.
    return flat_out.reshape(N, C, H, W)


if __name__ == "__main__":
    key = jax.random.PRNGKey(0)
    k0, k1, k2 = jax.random.split(key, 3)

    # Module defaults: C=128, H=7, W=7 (F = 6272); small batch N=2.
    N, C, H, W = 2, 128, 7, 7
    F = C * H * W

    # 1) Small input via the reshape fast path (no copy).
    x = jax.random.normal(k0, (N, F), dtype=jnp.float32)
    y = jax.block_until_ready(unflatten(x, C=C, H=H, W=W))
    assert y.shape == (N, C, H, W), y.shape
    assert y.dtype == x.dtype
    assert jnp.array_equal(y, x.reshape(N, C, H, W)), "mismatch (fast path)"

    # 2) Same small input forced through the Pallas copy (single-block grid).
    y_p = jax.block_until_ready(unflatten(x, C=C, H=H, W=W, use_pallas=True))
    assert jnp.array_equal(y_p, x.reshape(N, C, H, W)), "mismatch (pallas, small)"

    # 3) Larger batch: multi-step pipelined grid (8 blocks of 40 rows, ~1 MiB
    #    each), batch axis parallel across TensorCores.
    N2 = 320
    x2 = jax.random.normal(k1, (N2, F), dtype=jnp.float32)
    y2 = jax.block_until_ready(unflatten(x2, C=C, H=H, W=W))
    assert jnp.array_equal(y2, x2.reshape(N2, C, H, W)), "mismatch (large batch)"

    # 4) Batch that does not divide the block: masked-tail block path.
    N3 = 321
    x3 = jax.random.normal(k2, (N3, F), dtype=jnp.float32)
    y3 = jax.block_until_ready(unflatten(x3, C=C, H=H, W=W))
    assert jnp.array_equal(y3, x3.reshape(N3, C, H, W)), "mismatch (masked tail)"

    print("KERNEL_OK")
</pallas_src>

<mosaic_0001>
module attributes {stable_mosaic.version = 11 : i64} {
  func.func @_copy_kernel(%arg0: i32, %arg1: memref<2x6272xf32, #tpu.memory_space<vmem>>, %arg2: memref<2x6272xf32, #tpu.memory_space<vmem>>) attributes {dimension_semantics = [#tpu.dimension_semantics<parallel>], iteration_bounds = array<i64: 1>, scalar_prefetch = 0 : i64, scratch_operands = 0 : i64, tpu.core_type = #tpu.core_type<tc>, window_params = [{transform_indices = @transform_0, window_bounds = array<i64: 2, 6272>}, {transform_indices = @transform_1, window_bounds = array<i64: 2, 6272>}]} {
    %c0 = arith.constant 0 : index
    %c0_0 = arith.constant 0 : index
    %0 = vector.load %arg1[%c0, %c0_0] : memref<2x6272xf32, #tpu.memory_space<vmem>>, vector<2x6272xf32>
    %c0_1 = arith.constant 0 : index
    %c0_2 = arith.constant 0 : index
    %1 = vector.load %arg2[%c0_1, %c0_2] : memref<2x6272xf32, #tpu.memory_space<vmem>>, vector<2x6272xf32>
    tpu.vector_store %arg2[%c0_1, %c0_2], %0 {strides = array<i32>} : memref<2x6272xf32, #tpu.memory_space<vmem>>, vector<2x6272xf32>,
    return
  }
  func.func @transform_0(%arg0: i32) -> (i32, i32) {
    %c0_i32 = arith.constant 0 : i32
    %c0_i32_0 = arith.constant 0 : i32
    return %arg0, %c0_i32 : i32, i32
  }
  func.func @transform_1(%arg0: i32) -> (i32, i32) {
    %c0_i32 = arith.constant 0 : i32
    %c0_i32_0 = arith.constant 0 : i32
    return %arg0, %c0_i32 : i32, i32
  }
}

</mosaic_0001>

<bundles_post_ra>
// kernel: tpu_custom_call.1
= control target key start
LH: loop header
LB: loop body
LE: loop exit
PB: predicated region body
PF: predicated region fallthrough
CT: control target
= control target key end

     0   :  { %6 = vsyncpa [#allocation3], 0  ;;  %s138_s0 = inlined_call_operand.hbm [shape: f32[2,6272], index: 0, kind: input, shape index: {}, may-alias: {0,1}]   ;;  %s139_s1 = inlined_call_operand.hbm [shape: f32[2,6272], index: 1, kind: output, shape index: {}, may-alias: {0,1}]  }
   0x1   :  { %7 = vsyncpa [#allocation4], 0  ;;  %s13_s8 = sshll.u32 %s138_s0, 4  ;;  %s120_s9 = smov [#allocation2]   ;;  %s14_s8 = int_to_ptr.hbm [resolvable:$true] %s13_s8 }
   0x2   :  { %s15_s10 = sshll.u32 %s120_s9, 4  ;;  %s16_s10 = int_to_ptr.vmem [resolvable:$true] %s15_s10 }
   0x3   :  { %18 = dma.hbm_to_vmem [thread:$0]  %s14_s8, 1568, %s16_s10, [#allocation3]  }
   0x4   :  { %116 = dma.done.wait [#allocation3], 1568  }
   0x5   :  { %117 = vsyncadd [#allocation3], 4294965728  ;;  %v23_v0 = vld [vmem:[#allocation2] sm:$0xff]  ;;  %v24_v1 = vld [vmem:[#allocation2 + $0x8] sm:$0xff]  ;;  %s121_s0 = smov [#allocation5]   ;;  %s56_s14 = sshll.u32 %s139_s1, 4  ;;  %s57_s14 = int_to_ptr.hbm [resolvable:$true] %s56_s14 }
   0x6   :  { %v25_v2 = vld [vmem:[#allocation2 + $0x10] sm:$0xff]  ;;  %36 = vst [vmem:[#allocation5] sm:$0xff] %v23_v0  ;;  %v26_v3 = vld [vmem:[#allocation2 + $0x18] sm:$0xff]  ;;  %v27_v4 = vld [vmem:[#allocation2 + $0x20] sm:$0xff]  ;;  %s54_s11 = sshll.u32 %s121_s0, 4  ;;  %s55_s11 = int_to_ptr.vmem [resolvable:$true] %s54_s11 }
   0x7   :  { %37 = vst [vmem:[#allocation5 + $0x8] sm:$0xff] %v24_v1  ;;  %v28_v5 = vld [vmem:[#allocation2 + $0x28] sm:$0xff]  ;;  %v29_v6 = vld [vmem:[#allocation2 + $0x30] sm:$0xff]  ;;  %v30_v7 = vld [vmem:[#allocation2 + $0x38] sm:$0xff] }
   0x8   :  { %38 = vst [vmem:[#allocation5 + $0x10] sm:$0xff] %v25_v2  ;;  %v31_v8 = vld [vmem:[#allocation2 + $0x40] sm:$0xff]  ;;  %v32_v9 = vld [vmem:[#allocation2 + $0x48] sm:$0xff]  ;;  %v33_v10 = vld [vmem:[#allocation2 + $0x50] sm:$0xff] }
   0x9   :  { %39 = vst [vmem:[#allocation5 + $0x18] sm:$0xff] %v26_v3  ;;  %v34_v11 = vld [vmem:[#allocation2 + $0x58] sm:$0xff]  ;;  %v35_v12 = vld [vmem:[#allocation2 + $0x60] sm:$0x3] }
   0xa   :  { %40 = vst [vmem:[#allocation5 + $0x20] sm:$0xff] %v27_v4 }
   0xb   :  { %41 = vst [vmem:[#allocation5 + $0x28] sm:$0xff] %v28_v5 }
   0xc   :  { %42 = vst [vmem:[#allocation5 + $0x30] sm:$0xff] %v29_v6 }
   0xd   :  { %43 = vst [vmem:[#allocation5 + $0x38] sm:$0xff] %v30_v7 }
   0xe   :  { %44 = vst [vmem:[#allocation5 + $0x40] sm:$0xff] %v31_v8 }
   0xf   :  { %45 = vst [vmem:[#allocation5 + $0x48] sm:$0xff] %v32_v9 }
  0x10   :  { %46 = vst [vmem:[#allocation5 + $0x50] sm:$0xff] %v33_v10 }
  0x11   :  { %47 = vst [vmem:[#allocation5 + $0x58] sm:$0xff] %v34_v11 }
  0x12   :  { %48 = vst [vmem:[#allocation5 + $0x60] sm:$0x3] %v35_v12 }
  0x13   :  { %59 = dma.vmem_to_hbm [thread:$0]  %s55_s11, 1568, %s57_s14, [#allocation4]  }
  0x14   :  { %118 = dma.done.wait [#allocation4], 1568  }
  0x15   :  { %119 = vsyncadd [#allocation4], 4294965728 }
  0x16   :  { %64 = vsyncpa [#allocation3], 1 }
  0x17   :  { %65 = vsyncpa [#allocation4], 1 }

</bundles_post_ra>
